<compile_context>
chip_gen: v6e
topology: v6e:2x2x1
jax: 0.10.0
libtpu: 0.0.40
codegen_flags: <defaults>
</compile_context>

<pallas_src>
import jax
import jax.numpy as jnp
from jax import lax
from jax.experimental import pallas as pl
from jax.experimental.pallas import tpu as pltpu

BN_EPS = 1e-5

# Model geometry (fixed for this script; asserted in __main__).
D_IN = 16        # input features
H = 32           # hidden width of both layers
D_OUT = 1        # real output dim
LANE = 128       # TPU lane width; all packed slabs are lane-dense
GROUP_B = 128    # rows per BN group (= one PyTorch forward() mini-batch)

# Packed weight-slab rows: [0, D_IN) = W1 padded, [D_IN, D_IN+LANE) = W2 padded.
W_ROWS = D_IN + LANE   # 144 (multiple of 8)


def rl_net_kernel(x_ref, w_ref, p_ref, out_ref):
    """One grid step = G independent BN groups of GROUP_B rows each."""
    G = x_ref.shape[0]
    x = x_ref[...].astype(jnp.float32).reshape(G * GROUP_B, D_IN)
    p = p_ref[...]                                   # (8,128): g1, be1, g2, be2, w3^T, b3, pad

    def linear_bn_relu(h, w, gamma, beta):
        # Linear (bias dropped: exactly cancelled by BN mean subtraction).
        z = jnp.dot(h, w, preferred_element_type=jnp.float32)          # (G*GB, 128)
        zg = z.reshape(G, GROUP_B, LANE)
        # Training-mode BatchNorm1d stats per 128-row group (two-pass variance).
        mean = jnp.mean(zg, axis=1, keepdims=True)                     # (G,1,128)
        zc = zg - mean
        var = jnp.mean(zc * zc, axis=1, keepdims=True)                 # (G,1,128)
        scale = gamma * lax.rsqrt(var + BN_EPS)                        # (G,1,128)
        return jnp.maximum(zc * scale + beta, 0.0).reshape(G * GROUP_B, LANE)

    h = linear_bn_relu(x, w_ref[0:D_IN, :], p[0:1, :], p[1:2, :])
    h = linear_bn_relu(h, w_ref[D_IN:D_IN + LANE, :], p[2:3, :], p[3:4, :])

    # Final Linear (D_OUT=1), emitted transposed so the batch dim is lane-dense:
    # out_row[0, r] = sum_k w3[k] * h[r, k] + b3   -> (1, G*GROUP_B), one unmasked store.
    w3t = p[4:5, :]                                                    # (1,128): W3^T padded
    out_row = lax.dot_general(w3t, h, (((1,), (1,)), ((), ())),
                              preferred_element_type=jnp.float32) + p[5:6, 0:1]
    out_ref[...] = out_row.reshape(1, 1, G * GROUP_B)


def init_params(key, input_dim, hidden_dims, output_dim):
    """PyTorch-style init: U(-1/sqrt(fan_in), 1/sqrt(fan_in)) for Linear W/b;
    BN gamma=1, beta=0.  Weights stored pre-transposed as (in, out)."""
    params = []
    dims = [input_dim] + list(hidden_dims)
    for i in range(len(hidden_dims)):
        fan_in, fan_out = dims[i], dims[i + 1]
        key, kw, kb = jax.random.split(key, 3)
        bound = 1.0 / jnp.sqrt(fan_in)
        w = jax.random.uniform(kw, (fan_in, fan_out), jnp.float32, -bound, bound)
        b = jax.random.uniform(kb, (1, fan_out), jnp.float32, -bound, bound)
        g = jnp.ones((1, fan_out), jnp.float32)
        be = jnp.zeros((1, fan_out), jnp.float32)
        params.extend([w, b, g, be])
    fan_in = dims[-1]
    key, kw, kb = jax.random.split(key, 3)
    bound = 1.0 / jnp.sqrt(fan_in)
    w = jax.random.uniform(kw, (fan_in, output_dim), jnp.float32, -bound, bound)
    b = jax.random.uniform(kb, (1, output_dim), jnp.float32, -bound, bound)
    params.extend([w, b])
    return params


def pack_params(params):
    """Pack the 10 per-layer tensors into 2 lane-dense slabs (done once).
    b1/b2 are intentionally dropped (cancelled by training-mode BN)."""
    w1, _b1, g1, be1, w2, _b2, g2, be2, w3, b3 = params

    def pad_w(w, rows):
        slab = jnp.zeros((rows, LANE), jnp.float32)
        return slab.at[:w.shape[0], :w.shape[1]].set(w)

    def pad_row(r):
        row = jnp.zeros((1, LANE), jnp.float32)
        return row.at[:, :r.shape[1]].set(r)

    w_slab = jnp.concatenate([pad_w(w1, D_IN), pad_w(w2, LANE)], axis=0)   # (144,128)
    p_slab = jnp.concatenate([
        pad_row(g1), pad_row(be1), pad_row(g2), pad_row(be2),
        pad_row(w3.T),                                   # W3^T (1,H) padded to (1,128)
        jnp.full((1, LANE), b3[0, 0], jnp.float32),      # b3 broadcast row
        jnp.zeros((2, LANE), jnp.float32),               # pad to one (8,128) tile
    ], axis=0)                                           # (8,128)
    return w_slab, p_slab


def _default_groups_per_block(num_groups):
    """2 BN groups / 256 rows per step on 256x256-MXU chips (v6e/v7x), else 1."""
    try:
        kind = jax.devices()[0].device_kind.lower()
    except Exception:
        kind = ""
    if ("v6" in kind or "v7" in kind) and num_groups % 2 == 0:
        return 2
    return 1


def rl_net_forward(x_groups, w_slab, p_slab, output_dim=D_OUT, groups_per_block=None):
    """x_groups: (NUM_GROUPS, GROUP_B, D_IN); each 128-row group is one
    independent RL_Net forward (training-mode BN stats per group).
    Returns (NUM_GROUPS, GROUP_B, output_dim)."""
    NB, gb, d_in = x_groups.shape
    assert gb == GROUP_B and d_in == D_IN
    assert GROUP_B >= 2, "training-mode BatchNorm requires batch >= 2"
    G = _default_groups_per_block(NB) if groups_per_block is None else groups_per_block
    assert NB % G == 0
    num_blocks = NB // G

    cost = pl.CostEstimate(
        flops=2 * NB * GROUP_B * (D_IN * LANE + LANE * LANE + LANE),
        transcendentals=2 * LANE * NB,                       # two rsqrt rows per group
        bytes_accessed=(x_groups.size + w_slab.size + p_slab.size + NB * GROUP_B) * 4,
    )

    out = pl.pallas_call(
        rl_net_kernel,
        out_shape=jax.ShapeDtypeStruct((num_blocks, 1, G * GROUP_B), jnp.float32),
        grid_spec=pltpu.PrefetchScalarGridSpec(
            num_scalar_prefetch=0,
            grid=(num_blocks,),
            in_specs=[
                # x blocks stream / double-buffer across grid steps.
                pl.BlockSpec((G, GROUP_B, D_IN), lambda i: (i, 0, 0)),
                # Parameter slabs: constant index_map -> DMA'd once, VMEM-resident.
                pl.BlockSpec((W_ROWS, LANE), lambda i: (0, 0)),
                pl.BlockSpec((8, LANE), lambda i: (0, 0)),
            ],
            out_specs=pl.BlockSpec((1, 1, G * GROUP_B), lambda i: (i, 0, 0)),
        ),
        compiler_params=pltpu.CompilerParams(dimension_semantics=("parallel",)),
        cost_estimate=cost,
    )(x_groups, w_slab, p_slab)
    # (num_blocks, 1, G*GROUP_B) is row-major-contiguous with (NB, GROUP_B, 1).
    return out.reshape(NB, GROUP_B, output_dim)


def rl_net_reference(x_groups, params):
    """Pure-JAX reference with original PyTorch semantics (incl. b1/b2); each
    group is an independent forward pass (BN stats over that group)."""
    w1, b1, g1, be1, w2, b2, g2, be2, w3, b3 = params

    def block(h, w, b, g, be):
        h = h @ w + b
        mean = jnp.mean(h, axis=0, keepdims=True)
        var = jnp.mean((h - mean) ** 2, axis=0, keepdims=True)
        h = (h - mean) / jnp.sqrt(var + BN_EPS)
        return jnp.maximum(h * g + be, 0.0)

    def one_group(xg):
        h = block(xg, w1, b1, g1, be1)
        h = block(h, w2, b2, g2, be2)
        return h @ w3 + b3

    return jax.vmap(one_group)(x_groups)


if __name__ == "__main__":
    INPUT_DIM = D_IN
    HIDDEN_DIM = (H, H)
    OUTPUT_DIM = D_OUT
    NUM_GROUPS = 4          # 4 independent 128-row BN batches processed in one call

    assert HIDDEN_DIM == (H, H) and INPUT_DIM == D_IN and OUTPUT_DIM == D_OUT

    key = jax.random.PRNGKey(0)
    key, kx = jax.random.split(key)
    x = jax.random.normal(kx, (NUM_GROUPS, GROUP_B, INPUT_DIM), jnp.float32)

    params = init_params(key, INPUT_DIM, HIDDEN_DIM, OUTPUT_DIM)
    w_slab, p_slab = pack_params(params)   # pack once, reuse every call

    out = rl_net_forward(x, w_slab, p_slab, OUTPUT_DIM)
    out = jax.block_until_ready(out)

    ref = rl_net_reference(x, params)
    assert out.shape == (NUM_GROUPS, GROUP_B, OUTPUT_DIM)
    assert jnp.allclose(out, ref, atol=1e-4, rtol=1e-4), "mismatch vs reference"

    print("KERNEL_OK")
</pallas_src>

<mosaic_0001>
module attributes {stable_mosaic.version = 11 : i64} {
  func.func @rl_net_kernel(%arg0: i32, %arg1: memref<1x128x16xf32, #tpu.memory_space<vmem>>, %arg2: memref<144x128xf32, #tpu.memory_space<vmem>>, %arg3: memref<8x128xf32, #tpu.memory_space<vmem>>, %arg4: memref<1x1x128xf32, #tpu.memory_space<vmem>>) attributes {dimension_semantics = [#tpu.dimension_semantics<parallel>], iteration_bounds = array<i64: 4>, scalar_prefetch = 0 : i64, scratch_operands = 0 : i64, tpu.core_type = #tpu.core_type<tc>, window_params = [{transform_indices = @transform_0, window_bounds = array<i64: 1, 128, 16>}, {pipeline_mode = #tpu.pipeline_mode<synchronous>, transform_indices = @transform_1, window_bounds = array<i64: 144, 128>}, {pipeline_mode = #tpu.pipeline_mode<synchronous>, transform_indices = @transform_2, window_bounds = array<i64: 8, 128>}, {transform_indices = @transform_3, window_bounds = array<i64: 1, 1, 128>}]} {
    %c0 = arith.constant 0 : index
    %c0_0 = arith.constant 0 : index
    %c0_1 = arith.constant 0 : index
    %0 = vector.load %arg1[%c0, %c0_0, %c0_1] : memref<1x128x16xf32, #tpu.memory_space<vmem>>, vector<1x128x16xf32>
    %1 = vector.shape_cast %0 : vector<1x128x16xf32> to vector<128x16xf32>
    %c0_2 = arith.constant 0 : index
    %c0_3 = arith.constant 0 : index
    %2 = vector.load %arg3[%c0_2, %c0_3] : memref<8x128xf32, #tpu.memory_space<vmem>>, vector<8x128xf32>
    %c0_4 = arith.constant 0 : index
    %c0_5 = arith.constant 0 : index
    %3 = vector.load %arg2[%c0_4, %c0_5] : memref<144x128xf32, #tpu.memory_space<vmem>>, vector<16x128xf32>
    %4 = vector.extract_strided_slice %2 {offsets = [0, 0], sizes = [1, 128], strides = [1, 1]} : vector<8x128xf32> to vector<1x128xf32>
    %5 = vector.extract_strided_slice %2 {offsets = [1, 0], sizes = [1, 128], strides = [1, 1]} : vector<8x128xf32> to vector<1x128xf32>
    %cst = arith.constant dense<0.000000e+00> : vector<128x128xf32>
    %6 = tpu.matmul %1, %3, %cst {dimension_numbers = #tpu.dot_dimension_numbers<[1], [0], [0], [1], [0, 0, 1, 1], [], []>} : vector<128x16xf32>, vector<16x128xf32>, vector<128x128xf32> -> vector<128x128xf32>
    %7 = vector.shape_cast %6 : vector<128x128xf32> to vector<1x128x128xf32>
    %cst_6 = arith.constant dense<0.000000e+00> : vector<1x128xf32>
    %8 = vector.multi_reduction <add>, %7, %cst_6 [1] : vector<1x128x128xf32> to vector<1x128xf32>
    %9 = vector.shape_cast %8 : vector<1x128xf32> to vector<1x1x128xf32>
    %cst_7 = arith.constant 1.280000e+02 : f32
    %10 = vector.broadcast %cst_7 : f32 to vector<1x1x128xf32>
    %11 = arith.divf %9, %10 : vector<1x1x128xf32>
    %12 = vector.broadcast %11 : vector<1x1x128xf32> to vector<1x128x128xf32>
    %13 = arith.subf %7, %12 : vector<1x128x128xf32>
    %14 = arith.mulf %13, %13 : vector<1x128x128xf32>
    %cst_8 = arith.constant dense<0.000000e+00> : vector<1x128xf32>
    %15 = vector.multi_reduction <add>, %14, %cst_8 [1] : vector<1x128x128xf32> to vector<1x128xf32>
    %16 = vector.shape_cast %15 : vector<1x128xf32> to vector<1x1x128xf32>
    %cst_9 = arith.constant 1.280000e+02 : f32
    %17 = vector.broadcast %cst_9 : f32 to vector<1x1x128xf32>
    %18 = arith.divf %16, %17 : vector<1x1x128xf32>
    %cst_10 = arith.constant 9.99999974E-6 : f32
    %19 = vector.broadcast %cst_10 : f32 to vector<1x1x128xf32>
    %20 = arith.addf %18, %19 : vector<1x1x128xf32>
    %21 = math.rsqrt %20 : vector<1x1x128xf32>
    %22 = vector.shape_cast %4 : vector<1x128xf32> to vector<1x1x128xf32>
    %23 = arith.mulf %22, %21 : vector<1x1x128xf32>
    %24 = vector.broadcast %23 : vector<1x1x128xf32> to vector<1x128x128xf32>
    %25 = arith.mulf %13, %24 : vector<1x128x128xf32>
    %26 = vector.shape_cast %5 : vector<1x128xf32> to vector<1x1x128xf32>
    %27 = vector.broadcast %26 : vector<1x1x128xf32> to vector<1x128x128xf32>
    %28 = arith.addf %25, %27 : vector<1x128x128xf32>
    %cst_11 = arith.constant 0.000000e+00 : f32
    %29 = vector.broadcast %cst_11 : f32 to vector<1x128x128xf32>
    %30 = arith.maximumf %28, %29 : vector<1x128x128xf32>
    %31 = vector.shape_cast %30 : vector<1x128x128xf32> to vector<128x128xf32>
    %c16 = arith.constant 16 : index
    %c0_12 = arith.constant 0 : index
    %32 = vector.load %arg2[%c16, %c0_12] : memref<144x128xf32, #tpu.memory_space<vmem>>, vector<128x128xf32>
    %33 = vector.extract_strided_slice %2 {offsets = [2, 0], sizes = [1, 128], strides = [1, 1]} : vector<8x128xf32> to vector<1x128xf32>
    %34 = vector.extract_strided_slice %2 {offsets = [3, 0], sizes = [1, 128], strides = [1, 1]} : vector<8x128xf32> to vector<1x128xf32>
    %cst_13 = arith.constant dense<0.000000e+00> : vector<128x128xf32>
    %35 = tpu.matmul %31, %32, %cst_13 {dimension_numbers = #tpu.dot_dimension_numbers<[1], [0], [0], [1], [0, 0, 1, 1], [], []>} : vector<128x128xf32>, vector<128x128xf32>, vector<128x128xf32> -> vector<128x128xf32>
    %36 = vector.shape_cast %35 : vector<128x128xf32> to vector<1x128x128xf32>
    %cst_14 = arith.constant dense<0.000000e+00> : vector<1x128xf32>
    %37 = vector.multi_reduction <add>, %36, %cst_14 [1] : vector<1x128x128xf32> to vector<1x128xf32>
    %38 = vector.shape_cast %37 : vector<1x128xf32> to vector<1x1x128xf32>
    %cst_15 = arith.constant 1.280000e+02 : f32
    %39 = vector.broadcast %cst_15 : f32 to vector<1x1x128xf32>
    %40 = arith.divf %38, %39 : vector<1x1x128xf32>
    %41 = vector.broadcast %40 : vector<1x1x128xf32> to vector<1x128x128xf32>
    %42 = arith.subf %36, %41 : vector<1x128x128xf32>
    %43 = arith.mulf %42, %42 : vector<1x128x128xf32>
    %cst_16 = arith.constant dense<0.000000e+00> : vector<1x128xf32>
    %44 = vector.multi_reduction <add>, %43, %cst_16 [1] : vector<1x128x128xf32> to vector<1x128xf32>
    %45 = vector.shape_cast %44 : vector<1x128xf32> to vector<1x1x128xf32>
    %cst_17 = arith.constant 1.280000e+02 : f32
    %46 = vector.broadcast %cst_17 : f32 to vector<1x1x128xf32>
    %47 = arith.divf %45, %46 : vector<1x1x128xf32>
    %cst_18 = arith.constant 9.99999974E-6 : f32
    %48 = vector.broadcast %cst_18 : f32 to vector<1x1x128xf32>
    %49 = arith.addf %47, %48 : vector<1x1x128xf32>
    %50 = math.rsqrt %49 : vector<1x1x128xf32>
    %51 = vector.shape_cast %33 : vector<1x128xf32> to vector<1x1x128xf32>
    %52 = arith.mulf %51, %50 : vector<1x1x128xf32>
    %53 = vector.broadcast %52 : vector<1x1x128xf32> to vector<1x128x128xf32>
    %54 = arith.mulf %42, %53 : vector<1x128x128xf32>
    %55 = vector.shape_cast %34 : vector<1x128xf32> to vector<1x1x128xf32>
    %56 = vector.broadcast %55 : vector<1x1x128xf32> to vector<1x128x128xf32>
    %57 = arith.addf %54, %56 : vector<1x128x128xf32>
    %cst_19 = arith.constant 0.000000e+00 : f32
    %58 = vector.broadcast %cst_19 : f32 to vector<1x128x128xf32>
    %59 = arith.maximumf %57, %58 : vector<1x128x128xf32>
    %60 = vector.shape_cast %59 : vector<1x128x128xf32> to vector<128x128xf32>
    %61 = vector.extract_strided_slice %2 {offsets = [4, 0], sizes = [1, 128], strides = [1, 1]} : vector<8x128xf32> to vector<1x128xf32>
    %cst_20 = arith.constant dense<0.000000e+00> : vector<1x128xf32>
    %62 = tpu.matmul %61, %60, %cst_20 {dimension_numbers = #tpu.dot_dimension_numbers<[1], [1], [0], [0], [0, 0, 1, 0], [], []>} : vector<1x128xf32>, vector<128x128xf32>, vector<1x128xf32> -> vector<1x128xf32>
    %63 = vector.extract_strided_slice %2 {offsets = [5, 0], sizes = [1, 1], strides = [1, 1]} : vector<8x128xf32> to vector<1x1xf32>
    %64 = vector.broadcast %63 : vector<1x1xf32> to vector<1x128xf32>
    %65 = arith.addf %62, %64 : vector<1x128xf32>
    %66 = vector.shape_cast %65 : vector<1x128xf32> to vector<1x1x128xf32>
    %c0_21 = arith.constant 0 : index
    %c0_22 = arith.constant 0 : index
    %c0_23 = arith.constant 0 : index
    %67 = vector.load %arg4[%c0_21, %c0_22, %c0_23] : memref<1x1x128xf32, #tpu.memory_space<vmem>>, vector<1x1x128xf32>
    tpu.vector_store %arg4[%c0_21, %c0_22, %c0_23], %66 {strides = array<i32>} : memref<1x1x128xf32, #tpu.memory_space<vmem>>, vector<1x1x128xf32>,
    return
  }
  func.func @transform_0(%arg0: i32) -> (i32, i32, i32) {
    %c0_i32 = arith.constant 0 : i32
    %c0_i32_0 = arith.constant 0 : i32
    %c0_i32_1 = arith.constant 0 : i32
    return %arg0, %c0_i32, %c0_i32_0 : i32, i32, i32
  }
  func.func @transform_1(%arg0: i32) -> (i32, i32) {
    %c0_i32 = arith.constant 0 : i32
    %c0_i32_0 = arith.constant 0 : i32
    %c0_i32_1 = arith.constant 0 : i32
    return %c0_i32, %c0_i32_0 : i32, i32
  }
  func.func @transform_2(%arg0: i32) -> (i32, i32) {
    %c0_i32 = arith.constant 0 : i32
    %c0_i32_0 = arith.constant 0 : i32
    %c0_i32_1 = arith.constant 0 : i32
    return %c0_i32, %c0_i32_0 : i32, i32
  }
  func.func @transform_3(%arg0: i32) -> (i32, i32, i32) {
    %c0_i32 = arith.constant 0 : i32
    %c0_i32_0 = arith.constant 0 : i32
    %c0_i32_1 = arith.constant 0 : i32
    return %arg0, %c0_i32, %c0_i32_0 : i32, i32, i32
  }
}

</mosaic_0001>

<bundles_post_ra>
// kernel: tpu_custom_call.1
= control target key start
LH: loop header
LB: loop body
LE: loop exit
PB: predicated region body
PF: predicated region fallthrough
CT: control target
= control target key end

     0   :  { %8 = vsyncpa [#allocation3], 0  ;;  %s1686_s0 = inlined_call_operand.vmem [shape: f32[4,128,16], index: 0, kind: input, shape index: {}]   ;;  %s1687_s1 = inlined_call_operand.vmem [shape: f32[144,128], index: 1, kind: input, shape index: {}]   ;;  %s1688_s2 = inlined_call_operand.vmem [shape: f32[8,128], index: 2, kind: input, shape index: {}]   ;;  %s1689_s3 = inlined_call_operand.hbm [shape: f32[4,1,128], index: 3, kind: output, shape index: {}]  }
   0x1   :  { %10 = vsyncpa [#allocation3 + $0x1], 0  ;;  %s1305_s12 = smov 0   ;;  %s1307_s13 = smov 0  }
   0x2   :  { %s1309_s14 = smov 0   ;;  %s1311_s15 = smov 0  }
   0x3 LB: > { %s1326_s16 = sadd.s32 4294967295, %s1279_s15   ;;  %s960_s17 = sadd.s32 4294967294, %s1279_s15   ;;  %s1279_s15 = sphi %s1311_s15, %s1695_s15   ;;  %s1275_s14 = sphi %s1309_s14, %s1694_s14   ;;  %s1271_s13 = sphi %s1307_s13, %s1693_s13   ;;  %s1267_s12 = sphi %s1305_s12, %s1692_s12  }
   0x4   : > { %s1330_s18 = sadd.s32 1, %s1279_s15   ;;  %s91_s19 = sadd.s32 1, %s1275_s14 }
   0x5   : > { %s88_s20 = ssub.s32 %s1279_s15, %s1330_s18  ;;  %p101_p0 = scmp.ne.s32.totalorder %s1275_s14, %s1271_s13 }
   0x6   : > { %p89_p1 = scmp.eq.s32.totalorder %s88_s20, 0  ;;  %p102_p2 = scmp.eq.s32.totalorder %s1326_s16, 3 }
   0x7   : > { %p107_p3 = scmp.ne.s32.totalorder %s1271_s13, %s1267_s12  ;;  %p108_p4 = scmp.eq.s32.totalorder %s960_s17, 3 }
   0x8   : > { %s1341_s21 = scalar_select %p89_p1, %s1275_s14, %s91_s19  }
   0x9   : > { %p1343_p5 = por %p102_p2, %p101_p0  ;;  %p1347_p6 = por %p108_p4, %p107_p3 }
   0xa   : > { %p963_p7 = scmp.ge.s32.totalorder %s1279_s15, 1  ;;  %p140_p8 = scmp.lt.s32.totalorder %s1279_s15, 5 }
   0xc   : > { %p141_p9 = pnand %p963_p7, %p140_p8 }
   0xd   : > { %p163_p10 = scmp.lt.s32.totalorder (!%p141_p9), %s1326_s16, 3  ;;  %s161_s4 = sand.u32 (!%p141_p9), 1, %s1271_s13  }
   0xe   : > { %144 = sbr.rel (%p141_p9) target bundleno = 927 (0x39f), region = 32  ;;  %s162_s6 = scalar_lea.vmem (!%p141_p9), [#allocation2], %s161_s4 }
   0xf   : > { %s905_s7 = sshll.u32 (!%p141_p9), %s162_s6, 4  ;;  %s893_s11 = scalar_lea.sflag (!%p141_p9), [#allocation3], %s161_s4  ;;  %s906_s7 = int_to_ptr.vmem [resolvable:$true] %s905_s7 }
  0x10   : > { %s1219_s17 = scalar_lea.vmem (!%p141_p9), %s906_s7, 16  ;;  %s1284_s19 = smov (!%p141_p9), [#allocation2]  }
  0x11   : > { %p1220_p11 = scmp.ne.s32.totalorder (!%p141_p9), %s906_s7, %s1219_s17 }
  0x13   : > { %v186_v0 = vld [vmem:[%s1687_s1 + $0x8] sm:$0xff]  ;;  %v185_v1 = vld [vmem:[%s1687_s1] sm:$0xff]  ;;  %s164_s28 = scalar_select %p163_p10, %s1326_s16, 3  ;;  %vm187_vm0 = vcmask 130048   ;;  %v530_v20 = vld [vmem:[%s1687_s1 + $0x78] sm:$0xff]  ;;  %vm1282_vm1 = vmmov 0  }
  0x14   : > { %1053 = vmatprep.subr.mxu1 %v186_v0  ;;  %v532_v18 = vld [vmem:[%s1687_s1 + $0x88] sm:$0xff]  ;;  %v531_v19 = vld [vmem:[%s1687_s1 + $0x80] sm:$0xff]  ;;  %v529_v21 = vld [vmem:[%s1687_s1 + $0x70] sm:$0xff]  ;;  %p1221_p12 = pnand %p1220_p11, %p1343_p5 }
  0x15   : > { %1054 = vmatpush3.msra.mxu1 %v186_v0  ;;  %s985_s29 = sshll.u32 %s164_s28, 7  ;;  %v528_v22 = vld [vmem:[%s1687_s1 + $0x68] sm:$0xff]  ;;  %v527_v23 = vld [vmem:[%s1687_s1 + $0x60] sm:$0xff]  ;;  %v526_v24 = vld [vmem:[%s1687_s1 + $0x58] sm:$0xff] }
  0x16   : > { %1055 = vmatprep.subr.mxu1 %v185_v1  ;;  %s1364_s5 = scalar_lea.vmem %s1686_s0, %s985_s29  ;;  %v525_v25 = vld [vmem:[%s1687_s1 + $0x50] sm:$0xff]  ;;  %v524_v26 = vld [vmem:[%s1687_s1 + $0x48] sm:$0xff]  ;;  %v523_v27 = vld [vmem:[%s1687_s1 + $0x40] sm:$0xff]  ;;  %p1222_p13 = pneg %p1221_p12 }
  0x17   : > { %1056 = vmatpush3.msra.mxu1 %v185_v1  ;;  %v168_v2 = vld [vmem:[%s1364_s5] sm:$0xff]  ;;  %v169_v3 = vld [vmem:[%s1364_s5 + $0x8] sm:$0xff]  ;;  %v170_v4 = vld [vmem:[%s1364_s5 + $0x10] sm:$0xff] }
  0x18   : > { %1057 = vmatprep.mubr.msk.f32.mxu1 %vm187_vm0, %v168_v2  ;;  %v171_v5 = vld [vmem:[%s1364_s5 + $0x18] sm:$0xff]  ;;  %v172_v6 = vld [vmem:[%s1364_s5 + $0x20] sm:$0xff]  ;;  %v173_v7 = vld [vmem:[%s1364_s5 + $0x28] sm:$0xff]  ;;  %1081 = vmatprep.subr.mxu1 %v532_v18 }
  0x19   : > { %1058 = vmatmul.mubr.msk.f32.vlgmr.msra.gmra.mxu1 %vm187_vm0, %v169_v3  ;;  %v174_v8 = vld [vmem:[%s1364_s5 + $0x30] sm:$0xff]  ;;  %v175_v9 = vld [vmem:[%s1364_s5 + $0x38] sm:$0xff]  ;;  %v176_v10 = vld [vmem:[%s1364_s5 + $0x40] sm:$0xff] }
  0x1a   : > { %1060 = vmatprep.mubr.msk.f32.mxu1 %vm187_vm0, %v170_v4  ;;  %v177_v11 = vld [vmem:[%s1364_s5 + $0x48] sm:$0xff]  ;;  %v178_v12 = vld [vmem:[%s1364_s5 + $0x50] sm:$0xff]  ;;  %v179_v13 = vld [vmem:[%s1364_s5 + $0x58] sm:$0xff]  ;;  %1082 = vmatpush3.msra.mxu1 %v532_v18 }
  0x1b   : > { %v180_v14 = vld [vmem:[%s1364_s5 + $0x60] sm:$0xff]  ;;  %v181_v15 = vld [vmem:[%s1364_s5 + $0x68] sm:$0xff]  ;;  %v182_v16 = vld [vmem:[%s1364_s5 + $0x70] sm:$0xff]  ;;  %1083 = vmatprep.subr.mxu1 %v531_v19 }
  0x1c   : > { %v183_v17 = vld [vmem:[%s1364_s5 + $0x78] sm:$0xff]  ;;  %1084 = vmatpush3.msra.mxu1 %v531_v19  ;;  %v521_v29 = vld [vmem:[%s1687_s1 + $0x30] sm:$0xff]  ;;  %v520_v30 = vld [vmem:[%s1687_s1 + $0x28] sm:$0xff]  ;;  %s982_s5 = sshll.u32 %s1326_s16, 4  ;;  %s1223_s16 = sshll.u32 %s1284_s19, 4  ;;  %s1224_s16 = int_to_ptr.vmem [resolvable:$false] %s1223_s16 }
  0x1d   : > { %1061 = vmatmul.mubr.msk.f32.gmra.mxu1 %vm187_vm0, %v171_v5  ;;  %1085 = vmatprep.subr.mxu1 %v530_v20  ;;  %v522_v28 = vld [vmem:[%s1687_s1 + $0x38] sm:$0xff]  ;;  %v519_v31 = vld [vmem:[%s1687_s1 + $0x20] sm:$0xff]  ;;  %v517_v33 = vld [vmem:[%s1687_s1 + $0x10] sm:$0xff]  ;;  %s1651_s10 = scalar_lea.hbm %s1689_s3, %s982_s5  ;;  %s1225_s20 = scalar_lea.vmem %s1224_s16, 32 }
  0x1e   : > { %1063 = vmatprep.mubr.msk.f32.mxu1 %vm187_vm0, %v172_v6  ;;  %1086 = vmatpush3.msra.mxu1 %v530_v20  ;;  %v518_v32 = vld [vmem:[%s1687_s1 + $0x18] sm:$0xff]  ;;  %p1226_p0 = scmp.lt.s32.totalorder %s906_s7, %s1224_s16  ;;  %p1227_p1 = scmp.lt.s32.totalorder %s1225_s20, %s1219_s17 }
  0x1f   : > { %1087 = vmatprep.subr.mxu1 %v529_v21 }
  0x20   : > { %1088 = vmatpush3.msra.mxu1 %v529_v21  ;;  %p1228_p2 = por %p1227_p1, %p1226_p0 }
  0x21   : > { %1064 = vmatmul.mubr.msk.f32.gmra.mxu1 %vm187_vm0, %v173_v7  ;;  %1089 = vmatprep.subr.mxu1 %v528_v22 }
  0x22   : > { %1066 = vmatprep.mubr.msk.f32.mxu1 %vm187_vm0, %v174_v8  ;;  %1090 = vmatpush3.msra.mxu1 %v528_v22  ;;  %p1229_p3 = pnand %p1228_p2, %p1222_p13 }
  0x23   : > { %1091 = vmatprep.subr.mxu1 %v527_v23 }
  0x24   : > { %1092 = vmatpush3.msra.mxu1 %v527_v23 }
  0x25   : > { %1067 = vmatmul.mubr.msk.f32.gmra.mxu1 %vm187_vm0, %v175_v9  ;;  %1093 = vmatprep.subr.mxu1 %v526_v24 }
  0x26   : > { %1069 = vmatprep.mubr.msk.f32.mxu1 %vm187_vm0, %v176_v10  ;;  %1094 = vmatpush3.msra.mxu1 %v526_v24 }
  0x27   : > { %1095 = vmatprep.subr.mxu1 %v525_v25 }
  0x28   : > { %1096 = vmatpush3.msra.mxu1 %v525_v25 }
  0x29   : > { %1070 = vmatmul.mubr.msk.f32.gmra.mxu1 %vm187_vm0, %v177_v11  ;;  %1097 = vmatprep.subr.mxu1 %v524_v26 }
  0x2a   : > { %1072 = vmatprep.mubr.msk.f32.mxu1 %vm187_vm0, %v178_v12  ;;  %1098 = vmatpush3.msra.mxu1 %v524_v26 }
  0x2b   : > { %1099 = vmatprep.subr.mxu1 %v523_v27 }
  0x2c   : > { %1100 = vmatpush3.msra.mxu1 %v523_v27 }
  0x2d   : > { %1073 = vmatmul.mubr.msk.f32.gmra.mxu1 %vm187_vm0, %v179_v13  ;;  %1101 = vmatprep.subr.mxu1 %v522_v28 }
  0x2e   : > { %1075 = vmatprep.mubr.msk.f32.mxu1 %vm187_vm0, %v180_v14  ;;  %1102 = vmatpush3.msra.mxu1 %v522_v28 }
  0x2f   : > { %1103 = vmatprep.subr.mxu1 %v521_v29 }
  0x30   : > { %1104 = vmatpush3.msra.mxu1 %v521_v29 }
  0x31   : > { %1076 = vmatmul.mubr.msk.f32.gmra.mxu1 %vm187_vm0, %v181_v15  ;;  %1105 = vmatprep.subr.mxu1 %v520_v30 }
  0x32   : > { %1078 = vmatprep.mubr.msk.f32.mxu1 %vm187_vm0, %v182_v16  ;;  %1106 = vmatpush3.msra.mxu1 %v520_v30 }
  0x33   : > { %1107 = vmatprep.subr.mxu1 %v519_v31 }
  0x34   : > { %1108 = vmatpush3.msra.mxu1 %v519_v31 }
  0x35   : > { %1079 = vmatmul.mubr.msk.f32.gmra.mxu1 %vm187_vm0, %v183_v17  ;;  %1109 = vmatprep.subr.mxu1 %v518_v32 }
  0x36   : > { %1110 = vmatpush3.msra.mxu1 %v518_v32 }
  0x37   : > { %1111 = vmatprep.subr.mxu1 %v517_v33 }
  0x38   : > { %1112 = vmatpush3.msra.mxu1 %v517_v33 }
  0xd9   : > { %v1059_v34 = vpop.f32.mrf.mxu1 }
  0xdb   : > { %v302_v35 = vpop.f32.mrf.mxu1 }
  0xdc   : > { %v381_v37 = vadd.f32 %v1059_v34, %v302_v35 }
  0xdd   : > { %v1062_v36 = vpop.f32.mrf.mxu1 }
  0xdf   : > { %v312_v38 = vpop.f32.mrf.mxu1 }
  0xe0   : > { %v382_v39 = vadd.f32 %v381_v37, %v312_v38 }
  0xe1   : > { %v1065_v40 = vpop.f32.mrf.mxu1 }
  0xe2   : > { %v383_v41 = vadd.f32 %v1062_v36, %v382_v39 }
  0xe3   : > { %v322_v42 = vpop.f32.mrf.mxu1 }
  0xe4   : > { %v384_v43 = vadd.f32 %v383_v41, %v322_v42 }
  0xe5   : > { %v1068_v44 = vpop.f32.mrf.mxu1 }
  0xe6   : > { %v385_v45 = vadd.f32 %v1065_v40, %v384_v43 }
  0xe7   : > { %v332_v46 = vpop.f32.mrf.mxu1 }
  0xe8   : > { %v386_v47 = vadd.f32 %v385_v45, %v332_v46 }
  0xe9   : > { %v1071_v48 = vpop.f32.mrf.mxu1 }
  0xea   : > { %v387_v49 = vadd.f32 %v1068_v44, %v386_v47 }
  0xeb   : > { %v342_v50 = vpop.f32.mrf.mxu1 }
  0xec   : > { %v388_v51 = vadd.f32 %v387_v49, %v342_v50 }
  0xed   : > { %v1074_v52 = vpop.f32.mrf.mxu1 }
  0xee   : > { %v389_v53 = vadd.f32 %v1071_v48, %v388_v51 }
  0xef   : > { %v352_v54 = vpop.f32.mrf.mxu1 }
  0xf0   : > { %v390_v55 = vadd.f32 %v389_v53, %v352_v54 }
  0xf1   : > { %v1077_v56 = vpop.f32.mrf.mxu1 }
  0xf2   : > { %v391_v57 = vadd.f32 %v1074_v52, %v390_v55 }
  0xf3   : > { %v362_v58 = vpop.f32.mrf.mxu1 }
  0xf4   : > { %v392_v59 = vadd.f32 %v391_v57, %v362_v58 }
  0xf5   : > { %v1080_v60 = vpop.f32.mrf.mxu1 }
  0xf6   : > { %v393_v61 = vadd.f32 %v1077_v56, %v392_v59 }
  0xf7   : > { %v372_v62 = vpop.f32.mrf.mxu1 }
  0xf8   : > { %v394_v63 = vadd.f32 %v393_v61, %v372_v62 }
  0xfa   : > { %v395_v0 = vadd.f32 %v1080_v60, %v394_v63  ;;  %v461_v63 = vlaneseq }
  0xfc   : > { %v396_v1 = vrot.slane %v395_v0, 4 }
  0xfe   : > { %v397_v2 = vadd.f32 %v396_v1, %v395_v0  ;;  %v1510_v0 = vshrl.u32 %v461_v63, 7  ;;  %v1515_v1 = vld [vmem:[%s1688_s2] sm:$0xff] }
 0x100   : > { %v398_v3 = vrot.slane %v397_v2, 2 }
 0x102   : > { %v399_v4 = vadd.f32 %v398_v3, %v397_v2  ;;  %v463_v2 = vsub.s32 0, %v1510_v0  ;;  %v483_v3 = vsub.s32 1, %v1510_v0 }
 0x104   : > { %v400_v5 = vrot.slane %v399_v4, 1 }
 0x106   : > { %v401_v6 = vadd.f32 %v400_v5, %v399_v4 }
 0x108   : > { %v403_v7 = vmul.f32 0.0078125, %v401_v6 }
 0x10a   : > { %v1446_v8 = vsub.f32 %v302_v35, %v403_v7  ;;  %v1448_v9 = vsub.f32 %v1059_v34, %v403_v7  ;;  %v1450_v10 = vsub.f32 %v312_v38, %v403_v7  ;;  %v1456_v13 = vsub.f32 %v1062_v36, %v403_v7 }
 0x10b   : > { %v1458_v14 = vsub.f32 %v322_v42, %v403_v7  ;;  %v1462_v17 = vsub.f32 %v1065_v40, %v403_v7  ;;  %v1466_v20 = vsub.f32 %v332_v46, %v403_v7  ;;  %v1470_v23 = vsub.f32 %v1068_v44, %v403_v7 }
 0x10c   : > { %v420_v11 = vmul.f32 %v1446_v8, %v1446_v8  ;;  %v421_v12 = vmul.f32 %v1448_v9, %v1448_v9  ;;  %v422_v15 = vmul.f32 %v1450_v10, %v1450_v10  ;;  %v423_v18 = vmul.f32 %v1456_v13, %v1456_v13 }
 0x10d   : > { %v424_v21 = vmul.f32 %v1458_v14, %v1458_v14  ;;  %v425_v24 = vmul.f32 %v1462_v17, %v1462_v17  ;;  %v1474_v26 = vsub.f32 %v342_v50, %v403_v7  ;;  %v426_v27 = vmul.f32 %v1466_v20, %v1466_v20 }
 0x10e   : > { %v436_v16 = vadd.f32 %v421_v12, %v420_v11  ;;  %v1478_v29 = vsub.f32 %v1071_v48, %v403_v7  ;;  %v427_v30 = vmul.f32 %v1470_v23, %v1470_v23  ;;  %v1482_v32 = vsub.f32 %v352_v54, %v403_v7 }
 0x10f   : > { %v428_v33 = vmul.f32 %v1474_v26, %v1474_v26  ;;  %v1486_v35 = vsub.f32 %v1074_v52, %v403_v7  ;;  %v1490_v38 = vsub.f32 %v362_v58, %v403_v7  ;;  %v1494_v41 = vsub.f32 %v1077_v56, %v403_v7 }
 0x110   : > { %v437_v19 = vadd.f32 %v436_v16, %v422_v15  ;;  %v429_v36 = vmul.f32 %v1478_v29, %v1478_v29  ;;  %v430_v39 = vmul.f32 %v1482_v32, %v1482_v32  ;;  %v1498_v44 = vsub.f32 %v372_v62, %v403_v7 }
 0x111   : > { %v431_v42 = vmul.f32 %v1486_v35, %v1486_v35  ;;  %v432_v45 = vmul.f32 %v1490_v38, %v1490_v38  ;;  %v1502_v47 = vsub.f32 %v1080_v60, %v403_v7  ;;  %v433_v48 = vmul.f32 %v1494_v41, %v1494_v41 }
 0x112   : > { %v438_v22 = vadd.f32 %v437_v19, %v423_v18  ;;  %v434_v50 = vmul.f32 %v1498_v44, %v1498_v44  ;;  %v484_v7 = vrot.slane %v1515_v1, %v483_v3 }
 0x113   : > { %v435_v52 = vmul.f32 %v1502_v47, %v1502_v47 }
 0x114   : > { %v439_v25 = vadd.f32 %v438_v22, %v424_v21 }
 0x116   : > { %v440_v28 = vadd.f32 %v439_v25, %v425_v24 }
 0x118   : > { %v441_v31 = vadd.f32 %v440_v28, %v426_v27 }
 0x11a   : > { %v442_v34 = vadd.f32 %v441_v31, %v427_v30 }
 0x11c   : > { %v443_v37 = vadd.f32 %v442_v34, %v428_v33 }
 0x11e   : > { %v444_v40 = vadd.f32 %v443_v37, %v429_v36 }
 0x120   : > { %v445_v43 = vadd.f32 %v444_v40, %v430_v39 }
 0x122   : > { %v446_v46 = vadd.f32 %v445_v43, %v431_v42 }
 0x124   : > { %v447_v49 = vadd.f32 %v446_v46, %v432_v45 }
 0x126   : > { %v448_v51 = vadd.f32 %v447_v49, %v433_v48 }
 0x128   : > { %v449_v53 = vadd.f32 %v448_v51, %v434_v50 }
 0x12a   : > { %v450_v54 = vadd.f32 %v449_v53, %v435_v52 }
 0x12c   : > { %v451_v55 = vrot.slane %v450_v54, 4 }
 0x12e   : > { %v452_v56 = vadd.f32 %v451_v55, %v450_v54 }
 0x130   : > { %v453_v57 = vrot.slane %v452_v56, 2 }
 0x132   : > { %v454_v58 = vadd.f32 %v453_v57, %v452_v56 }
 0x134   : > { %v455_v59 = vrot.slane %v454_v58, 1 }
 0x136   : > { %v456_v60 = vadd.f32 %v455_v59, %v454_v58 }
 0x138   : > { %v457_v61 = vmul.f32 0.0078125, %v456_v60 }
 0x13a   : > { %v458_v62 = vadd.f32 1e-05, %v457_v61 }
 0x13c   : > { %1215 = vrsqrt.f32 %v458_v62 }
 0x149   : > { %v1216_v4 = vpop.eup %1215 }
 0x14a   : > { %v460_v5 = vmul.f32 %v1216_v4, %v1515_v1 }
 0x14c   : > { %v464_v6 = vrot.slane %v460_v5, %v463_v2 }
 0x14e   : > { %v465_v11 = vmul.f32 %v464_v6, %v1446_v8  ;;  %v466_v12 = vmul.f32 %v464_v6, %v1448_v9  ;;  %v467_v15 = vmul.f32 %v464_v6, %v1450_v10  ;;  %v468_v16 = vmul.f32 %v464_v6, %v1456_v13 }
 0x14f   : > { %v469_v22 = vmul.f32 %v464_v6, %v1458_v14  ;;  %v470_v28 = vmul.f32 %v464_v6, %v1462_v17  ;;  %v471_v8 = vmul.f32 %v464_v6, %v1466_v20  ;;  %v472_v13 = vmul.f32 %v464_v6, %v1470_v23 }
 0x150   : > { %v485_v18 = vadd.f32 %v484_v7, %v465_v11  ;;  %v486_v19 = vadd.f32 %v484_v7, %v466_v12  ;;  %v487_v21 = vadd.f32 %v484_v7, %v467_v15  ;;  %v488_v27 = vadd.f32 %v484_v7, %v468_v16 }
 0x151   : > { %v489_v31 = vadd.f32 %v484_v7, %v469_v22  ;;  %v490_v10 = vadd.f32 %v484_v7, %v470_v28  ;;  %v491_v34 = vadd.f32 %v484_v7, %v471_v8  ;;  %v473_v14 = vmul.f32 %v464_v6, %v1474_v26 }
 0x152   : > { %v501_v24 = vmax.f32 %v485_v18, 0.0  ;;  %v502_v25 = vmax.f32 %v486_v19, 0.0  ;;  %v503_v30 = vmax.f32 %v487_v21, 0.0  ;;  %v504_v9 = vmax.f32 %v488_v27, 0.0 }
 0x153   : > { %v505_v33 = vmax.f32 %v489_v31, 0.0  ;;  %v506_v36 = vmax.f32 %v490_v10, 0.0  ;;  %v492_v37 = vadd.f32 %v484_v7, %v472_v13  ;;  %v474_v17 = vmul.f32 %v464_v6, %v1478_v29 }
 0x154   : > { %1113 = vmatprep.mubr.f32.mxu1 %v501_v24  ;;  %v507_v39 = vmax.f32 %v491_v34, 0.0  ;;  %v493_v40 = vadd.f32 %v484_v7, %v473_v14  ;;  %v475_v20 = vmul.f32 %v464_v6, %v1482_v32  ;;  %v476_v23 = vmul.f32 %v464_v6, %v1486_v35 }
 0x155   : > { %1114 = vmatmul.mubr.f32.vlgmr.msra.gmra.mxu1 %v502_v25  ;;  %v508_v42 = vmax.f32 %v492_v37, 0.0  ;;  %v494_v43 = vadd.f32 %v484_v7, %v474_v17  ;;  %v477_v26 = vmul.f32 %v464_v6, %v1490_v38  ;;  %v478_v29 = vmul.f32 %v464_v6, %v1494_v41 }
 0x156   : > { %1116 = vmatprep.mubr.f32.mxu1 %v503_v30  ;;  %v509_v45 = vmax.f32 %v493_v40, 0.0  ;;  %v495_v46 = vadd.f32 %v484_v7, %v475_v20  ;;  %v496_v49 = vadd.f32 %v484_v7, %v476_v23  ;;  %v479_v50 = vmul.f32 %v464_v6, %v1498_v44 }
 0x157   : > { %v510_v48 = vmax.f32 %v494_v43, 0.0  ;;  %v497_v32 = vadd.f32 %v484_v7, %v477_v26  ;;  %v498_v53 = vadd.f32 %v484_v7, %v478_v29  ;;  %v480_v35 = vmul.f32 %v464_v6, %v1502_v47 }
 0x158   : > { %v511_v51 = vmax.f32 %v495_v46, 0.0  ;;  %v512_v52 = vmax.f32 %v496_v49, 0.0  ;;  %v499_v55 = vadd.f32 %v484_v7, %v479_v50  ;;  %v1281_v44 = vmov 0.0  }
 0x159   : > { %1117 = vmatmul.mubr.f32.gmra.mxu1 %v504_v9  ;;  %v513_v54 = vmax.f32 %v497_v32, 0.0  ;;  %v514_v38 = vmax.f32 %v498_v53, 0.0  ;;  %v500_v56 = vadd.f32 %v484_v7, %v480_v35  ;;  %1137 = vmatprep.subr.mxu0 %v1281_v44 }
 0x15a   : > { %1119 = vmatprep.mubr.f32.mxu1 %v505_v33  ;;  %v515_v57 = vmax.f32 %v499_v55, 0.0  ;;  %1169 = vmatprep.mubr.msk.f32.mxu0 %vm1282_vm1, %v1281_v44  ;;  %v1283_v55 = vmov 0  }
 0x15b   : > { %v516_v41 = vmax.f32 %v500_v56, 0.0  ;;  %1214 = vset.pattern.permute.xlu0 %v1283_v55 }
 0x15c   : > { %815 = vperm.xlu0 %1214, %v1515_v1  }
 0x15d   : > { %1120 = vmatmul.mubr.f32.gmra.mxu1 %v506_v36 }
 0x15e   : > { %1122 = vmatprep.mubr.f32.mxu1 %v507_v39 }
 0x161   : > { %1123 = vmatmul.mubr.f32.gmra.mxu1 %v508_v42 }
 0x162   : > { %1125 = vmatprep.mubr.f32.mxu1 %v509_v45 }
 0x165   : > { %1126 = vmatmul.mubr.f32.gmra.mxu1 %v510_v48 }
 0x166   : > { %1128 = vmatprep.mubr.f32.mxu1 %v511_v51 }
 0x169   : > { %1129 = vmatmul.mubr.f32.gmra.mxu1 %v512_v52 }
 0x16a   : > { %1131 = vmatprep.mubr.f32.mxu1 %v513_v54 }
 0x16d   : > { %1132 = vmatmul.mubr.f32.gmra.mxu1 %v514_v38 }
 0x16e   : > { %1134 = vmatprep.mubr.f32.mxu1 %v515_v57 }
 0x171   : > { %1135 = vmatmul.mubr.f32.gmra.mxu1 %v516_v41 }
 0x215   : > { %v1115_v58 = vpop.f32.mrf.mxu1 }
 0x217   : > { %v599_v59 = vpop.f32.mrf.mxu1 }
 0x218   : > { %v678_v61 = vadd.f32 %v1115_v58, %v599_v59 }
 0x219   : > { %v1118_v60 = vpop.f32.mrf.mxu1 }
 0x21b   : > { %v609_v62 = vpop.f32.mrf.mxu1 }
 0x21c   : > { %v679_v47 = vadd.f32 %v678_v61, %v609_v62 }
 0x21d   : > { %v1121_v63 = vpop.f32.mrf.mxu1 }
 0x21e   : > { %v680_v2 = vadd.f32 %v1118_v60, %v679_v47 }
 0x21f   : > { %v619_v3 = vpop.f32.mrf.mxu1 }
 0x220   : > { %v681_v4 = vadd.f32 %v680_v2, %v619_v3 }
 0x221   : > { %v1124_v5 = vpop.f32.mrf.mxu1 }
 0x222   : > { %v682_v6 = vadd.f32 %v1121_v63, %v681_v4 }
 0x223   : > { %v629_v7 = vpop.f32.mrf.mxu1 }
 0x224   : > { %v683_v11 = vadd.f32 %v682_v6, %v629_v7 }
 0x225   : > { %v1127_v12 = vpop.f32.mrf.mxu1 }
 0x226   : > { %v684_v15 = vadd.f32 %v1124_v5, %v683_v11 }
 0x227   : > { %v639_v16 = vpop.f32.mrf.mxu1 }
 0x228   : > { %v685_v18 = vadd.f32 %v684_v15, %v639_v16 }
 0x229   : > { %v1130_v19 = vpop.f32.mrf.mxu1 }
 0x22a   : > { %v686_v21 = vadd.f32 %v1127_v12, %v685_v18 }
 0x22b   : > { %v649_v22 = vpop.f32.mrf.mxu1 }
 0x22c   : > { %v687_v24 = vadd.f32 %v686_v21, %v649_v22 }
 0x22d   : > { %v1133_v25 = vpop.f32.mrf.mxu1 }
 0x22e   : > { %v688_v27 = vadd.f32 %v1130_v19, %v687_v24 }
 0x22f   : > { %v659_v28 = vpop.f32.mrf.mxu1 }
 0x230   : > { %v689_v30 = vadd.f32 %v688_v27, %v659_v28 }
 0x231   : > { %v1136_v31 = vpop.f32.mrf.mxu1 }
 0x232   : > { %v690_v8 = vadd.f32 %v1133_v25, %v689_v30 }
 0x233   : > { %v669_v9 = vpop.f32.mrf.mxu1 }
 0x234   : > { %v691_v10 = vadd.f32 %v690_v8, %v669_v9 }
 0x236   : > { %v692_v13 = vadd.f32 %v1136_v31, %v691_v10 }
 0x238   : > { %v693_v33 = vrot.slane %v692_v13, 4 }
 0x23a   : > { %v694_v34 = vadd.f32 %v693_v33, %v692_v13 }
 0x23c   : > { %v695_v14 = vrot.slane %v694_v34, 2 }
 0x23e   : > { %v696_v36 = vadd.f32 %v695_v14, %v694_v34 }
 0x240   : > { %v697_v37 = vrot.slane %v696_v36, 1 }
 0x242   : > { %v698_v17 = vadd.f32 %v697_v37, %v696_v36 }
 0x244   : > { %v699_v39 = vmul.f32 0.0078125, %v698_v17 }
 0x246   : > { %v1538_v40 = vsub.f32 %v599_v59, %v699_v39  ;;  %v1540_v20 = vsub.f32 %v1115_v58, %v699_v39  ;;  %v1542_v42 = vsub.f32 %v609_v62, %v699_v39  ;;  %v1548_v45 = vsub.f32 %v1118_v60, %v699_v39 }
 0x247   : > { %v1550_v46 = vsub.f32 %v619_v3, %v699_v39  ;;  %v1554_v49 = vsub.f32 %v1121_v63, %v699_v39  ;;  %v1559_v51 = vsub.f32 %v629_v7, %v699_v39  ;;  %v1563_v53 = vsub.f32 %v1124_v5, %v699_v39 }
 0x248   : > { %v716_v43 = vmul.f32 %v1538_v40, %v1538_v40  ;;  %v717_v23 = vmul.f32 %v1540_v20, %v1540_v20  ;;  %v718_v26 = vmul.f32 %v1542_v42, %v1542_v42  ;;  %v719_v29 = vmul.f32 %v1548_v45, %v1548_v45 }
 0x249   : > { %v720_v32 = vmul.f32 %v1550_v46, %v1550_v46  ;;  %v721_v35 = vmul.f32 %v1554_v49, %v1554_v49  ;;  %v1568_v38 = vsub.f32 %v639_v16, %v699_v39  ;;  %v722_v56 = vmul.f32 %v1559_v51, %v1559_v51 }
 0x24a   : > { %v732_v48 = vadd.f32 %v717_v23, %v716_v43  ;;  %v1572_v41 = vsub.f32 %v1127_v12, %v699_v39  ;;  %v723_v58 = vmul.f32 %v1563_v53, %v1563_v53  ;;  %v710_v60 = vsub.f32 %v649_v22, %v699_v39 }
 0x24b   : > { %v724_v61 = vmul.f32 %v1568_v38, %v1568_v38  ;;  %v711_v47 = vsub.f32 %v1130_v19, %v699_v39  ;;  %v712_v3 = vsub.f32 %v659_v28, %v699_v39  ;;  %v713_v6 = vsub.f32 %v1133_v25, %v699_v39 }
 0x24c   : > { %v733_v50 = vadd.f32 %v732_v48, %v718_v26  ;;  %v725_v63 = vmul.f32 %v1572_v41, %v1572_v41  ;;  %v726_v4 = vmul.f32 %v710_v60, %v710_v60  ;;  %v714_v12 = vsub.f32 %v669_v9, %v699_v39 }
 0x24d   : > { %v727_v7 = vmul.f32 %v711_v47, %v711_v47  ;;  %v728_v15 = vmul.f32 %v712_v3, %v712_v3  ;;  %v715_v18 = vsub.f32 %v1136_v31, %v699_v39  ;;  %v729_v21 = vmul.f32 %v713_v6, %v713_v6 }
 0x24e   : > { %v734_v52 = vadd.f32 %v733_v50, %v719_v29  ;;  %v730_v24 = vmul.f32 %v714_v12, %v714_v12  ;;  %v779_v9 = vsub.s32 3, %v1510_v0  ;;  %v759_v31 = vsub.s32 2, %v1510_v0 }
 0x24f   : > { %v731_v30 = vmul.f32 %v715_v18, %v715_v18 }
 0x250   : > { %v735_v54 = vadd.f32 %v734_v52, %v720_v32  ;;  %v1584_v39 = vrot.slane %v1515_v1, %v779_v9 }
 0x252   : > { %v736_v57 = vadd.f32 %v735_v54, %v721_v35 }
 0x254   : > { %v737_v59 = vadd.f32 %v736_v57, %v722_v56 }
 0x256   : > { %v738_v62 = vadd.f32 %v737_v59, %v723_v58 }
 0x258   : > { %v739_v2 = vadd.f32 %v738_v62, %v724_v61 }
 0x25a   : > { %v740_v5 = vadd.f32 %v739_v2, %v725_v63 }
 0x25c   : > { %v741_v11 = vadd.f32 %v740_v5, %v726_v4 }
 0x25e   : > { %v742_v16 = vadd.f32 %v741_v11, %v727_v7 }
 0x260   : > { %v743_v22 = vadd.f32 %v742_v16, %v728_v15 }
 0x262   : > { %v744_v27 = vadd.f32 %v743_v22, %v729_v21 }
 0x264   : > { %v745_v19 = vadd.f32 %v744_v27, %v730_v24 }
 0x266   : > { %v746_v8 = vadd.f32 %v745_v19, %v731_v30 }
 0x268   : > { %v747_v10 = vrot.slane %v746_v8, 4 }
 0x26a   : > { %v748_v13 = vadd.f32 %v747_v10, %v746_v8 }
 0x26c   : > { %v749_v33 = vrot.slane %v748_v13, 2 }
 0x26e   : > { %v750_v28 = vadd.f32 %v749_v33, %v748_v13  ;;  %v817_v13 = vrot.slane %v1515_v1, 4  ;;  %v816_v33 = vpop.permute.xlu0 %815 }
 0x270   : > { %v751_v34 = vrot.slane %v750_v28, 1 }
 0x272   : > { %v752_v14 = vadd.f32 %v751_v34, %v750_v28  ;;  %v819_v28 = vrot.slane %v816_v33, 5 }
 0x274   : > { %v753_v25 = vmul.f32 0.0078125, %v752_v14 }
 0x276   : > { %v754_v36 = vadd.f32 1e-05, %v753_v25 }
 0x278   : > { %1217 = vrsqrt.f32 %v754_v36 }
 0x285   : > { %v1218_v37 = vpop.eup %1217 }
 0x286   : > { %v756_v17 = vmul.f32 %v1218_v37, %v1515_v1 }
 0x288   : > { %v1586_v43 = vrot.slane %v756_v17, %v759_v31 }
 0x28a   : > { %v775_v23 = vmul.f32 %v1586_v43, %v714_v12  ;;  %v776_v26 = vmul.f32 %v1586_v43, %v715_v18  ;;  %v774_v32 = vmul.f32 %v1586_v43, %v713_v6  ;;  %v773_v35 = vmul.f32 %v1586_v43, %v712_v3 }
 0x28b   : > { %v772_v56 = vmul.f32 %v1586_v43, %v711_v47  ;;  %v771_v59 = vmul.f32 %v1586_v43, %v710_v60  ;;  %v770_v63 = vmul.f32 %v1586_v43, %v1572_v41  ;;  %v769_v3 = vmul.f32 %v1586_v43, %v1568_v38 }
 0x28c   : > { %v796_v48 = vadd.f32 %v1584_v39, %v776_v26  ;;  %v795_v50 = vadd.f32 %v1584_v39, %v775_v23  ;;  %v794_v52 = vadd.f32 %v1584_v39, %v774_v32  ;;  %v793_v55 = vadd.f32 %v1584_v39, %v773_v35 }
 0x28d   : > { %v792_v58 = vadd.f32 %v1584_v39, %v772_v56  ;;  %v791_v62 = vadd.f32 %v1584_v39, %v771_v59  ;;  %v790_v2 = vadd.f32 %v1584_v39, %v770_v63  ;;  %v789_v4 = vadd.f32 %v1584_v39, %v769_v3 }
 0x28e   : > { %v812_v29 = vmax.f32 %v796_v48, 0.0  ;;  %v811_v0 = vmax.f32 %v795_v50, 0.0  ;;  %v810_v54 = vmax.f32 %v794_v52, 0.0  ;;  %v809_v57 = vmax.f32 %v793_v55, 0.0 }
 0x28f   : > { %v808_v61 = vmax.f32 %v792_v58, 0.0  ;;  %v807_v47 = vmax.f32 %v791_v62, 0.0  ;;  %v806_v60 = vmax.f32 %v790_v2, 0.0  ;;  %v768_v5 = vmul.f32 %v1586_v43, %v1563_v53 }
 0x290   : > { %1138 = vmatpush3.xpose.msra.mxu0 %v812_v29  ;;  %v805_v41 = vmax.f32 %v789_v4, 0.0  ;;  %v767_v7 = vmul.f32 %v1586_v43, %v1559_v51  ;;  %v766_v12 = vmul.f32 %v1586_v43, %v1554_v49  ;;  %v765_v16 = vmul.f32 %v1586_v43, %v1550_v46 }
 0x291   : > { %1139 = vmatprep.subr.mxu0 %v1281_v44  ;;  %v788_v6 = vadd.f32 %v1584_v39, %v768_v5  ;;  %v764_v21 = vmul.f32 %v1586_v43, %v1548_v45  ;;  %v763_v24 = vmul.f32 %v1586_v43, %v1542_v42  ;;  %v762_v30 = vmul.f32 %v1586_v43, %v1540_v20 }
 0x292   : > { %v787_v11 = vadd.f32 %v1584_v39, %v767_v7  ;;  %v786_v15 = vadd.f32 %v1584_v39, %v766_v12  ;;  %v785_v18 = vadd.f32 %v1584_v39, %v765_v16  ;;  %v761_v42 = vmul.f32 %v1586_v43, %v1538_v40 }
 0x293   : > { %v804_v38 = vmax.f32 %v788_v6, 0.0  ;;  %v784_v22 = vadd.f32 %v1584_v39, %v764_v21  ;;  %v783_v27 = vadd.f32 %v1584_v39, %v763_v24  ;;  %v782_v19 = vadd.f32 %v1584_v39, %v762_v30 }
 0x294   : > { %1140 = vmatpush3.xpose.msra.mxu0 %v811_v0  ;;  %v803_v53 = vmax.f32 %v787_v11, 0.0  ;;  %v802_v51 = vmax.f32 %v786_v15, 0.0  ;;  %v801_v49 = vmax.f32 %v785_v18, 0.0  ;;  %v781_v10 = vadd.f32 %v1584_v39, %v761_v42 }
 0x295   : > { %1141 = vmatprep.subr.mxu0 %v1281_v44  ;;  %v800_v46 = vmax.f32 %v784_v22, 0.0  ;;  %v799_v45 = vmax.f32 %v783_v27, 0.0  ;;  %v798_v8 = vmax.f32 %v782_v19, 0.0 }
 0x296   : > { %v797_v20 = vmax.f32 %v781_v10, 0.0 }
 0x298   : > { %1142 = vmatpush3.xpose.msra.mxu0 %v810_v54 }
 0x299   : > { %1143 = vmatprep.subr.mxu0 %v1281_v44 }
 0x29c   : > { %1144 = vmatpush3.xpose.msra.mxu0 %v809_v57 }
 0x29d   : > { %1145 = vmatprep.subr.mxu0 %v1281_v44 }
 0x2a0   : > { %1146 = vmatpush3.xpose.msra.mxu0 %v808_v61 }
 0x2a1   : > { %1147 = vmatprep.subr.mxu0 %v1281_v44 }
 0x2a4   : > { %1148 = vmatpush3.xpose.msra.mxu0 %v807_v47 }
 0x2a5   : > { %1149 = vmatprep.subr.mxu0 %v1281_v44 }
 0x2a8   : > { %1150 = vmatpush3.xpose.msra.mxu0 %v806_v60 }
 0x2a9   : > { %1151 = vmatprep.subr.mxu0 %v1281_v44 }
 0x2ac   : > { %1152 = vmatpush3.xpose.msra.mxu0 %v805_v41 }
 0x2ad   : > { %1153 = vmatprep.subr.mxu0 %v1281_v44 }
 0x2b0   : > { %1154 = vmatpush3.xpose.msra.mxu0 %v804_v38 }
 0x2b1   : > { %1155 = vmatprep.subr.mxu0 %v1281_v44 }
 0x2b4   : > { %1156 = vmatpush3.xpose.msra.mxu0 %v803_v53 }
 0x2b5   : > { %1157 = vmatprep.subr.mxu0 %v1281_v44 }
 0x2b8   : > { %1158 = vmatpush3.xpose.msra.mxu0 %v802_v51 }
 0x2b9   : > { %1159 = vmatprep.subr.mxu0 %v1281_v44 }
 0x2bc   : > { %1160 = vmatpush3.xpose.msra.mxu0 %v801_v49 }
 0x2bd   : > { %1161 = vmatprep.subr.mxu0 %v1281_v44 }
 0x2c0   : > { %1162 = vmatpush3.xpose.msra.mxu0 %v800_v46 }
 0x2c1   : > { %1163 = vmatprep.subr.mxu0 %v1281_v44 }
 0x2c4   : > { %1164 = vmatpush3.xpose.msra.mxu0 %v799_v45 }
 0x2c5   : > { %1165 = vmatprep.subr.mxu0 %v1281_v44 }
 0x2c8   : > { %1166 = vmatpush3.xpose.msra.mxu0 %v798_v8 }
 0x2c9   : > { %1167 = vmatprep.subr.mxu0 %v1281_v44 }
 0x2cc   : > { %1168 = vmatpush3.xpose.msra.mxu0 %v797_v20 }
 0x2cf   : > { %1170 = vmatmul.mubr.f32.vlgmr.msra.gmra.mxu0 %v817_v13 }
 0x38f   : > { %v887_v40 = vpop.f32.mrf.mxu0 }
 0x390   : > { %v888_v34 = vadd.f32 %v887_v40, %v819_v28 }
 0x391   : > { %v1171_v44 = vpop.f32.mrf.mxu0 }
 0x392   : > { %891 = vst [vmem:[%s162_s6] sm:$0x1] %v888_v34 }
 0x393   : > { %1232 = shalt.err (!%p1229_p3)
}
 0x394   : > { %s1233_s24 = scalar_lea.hbm %s1651_s10, 16  ;;  %s1237_s27 = scalar_lea.hbm %s1689_s3, 64 }
 0x395   : > { %p1234_p4 = scmp.ne.s32.totalorder %s1651_s10, %s1233_s24  ;;  %p1238_p9 = scmp.lt.s32.totalorder %s1651_s10, %s1689_s3 }
 0x396   : > { %p1239_p10 = scmp.lt.s32.totalorder %s1237_s27, %s1233_s24 }
 0x397   : > { %p1235_p7 = pnand %p1234_p4, %p1343_p5 }
 0x398   : > { %p1240_p11 = por %p1239_p10, %p1238_p9 }
 0x399   : > { %p1236_p8 = pneg %p1235_p7 }
 0x39b   : > { %p1241_p12 = pnand %p1240_p11, %p1236_p8 }
 0x39d   : > { %1244 = shalt.err (!%p1241_p12)
}
 0x39e   : > { %1172 = dma.vmem_to_hbm [thread:$0]  (%p1343_p5), %s906_s7, 16, %s1651_s10, %s893_s11  }
 0x39f PF: > { %p1178_p13 = scmp.ge.s32.totalorder %s1279_s15, 2  ;;  %s917_s30 = sand.u32 1, %s1267_s12  }
 0x3a0   : > { %s918_s4 = scalar_lea.sflag [#allocation3], %s917_s30 }
 0x3a1   : > { %p1175_p0 = pnand %p1178_p13, %p1347_p6 }
 0x3a3   : > { %p1176_p1 = pneg %p1175_p0 }
 0x3a5   : > { %1262 = dma.done.wait (%p1176_p1), %s918_s4, 16  }
 0x3a6   : > { %1264 = vsyncadd (%p1176_p1), %s918_s4, 4294967280  ;;  %p13_p2 = scmp.ge.s32.totalorder %s1330_s18, 6   ;;  %s1692_s12 = smov %s1271_s13 }
 0x3a7   : > { %s1693_s13 = smov %s1275_s14  ;;  %s1694_s14 = smov %s1341_s21 }
 0x3a8   : > { %s1695_s15 = smov %s1330_s18  ;;  %15 = sbr.rel (!%p13_p2) target bundleno = 3 (0x3), region = 67 }
 0x3ad   :  { %922 = vsyncpa [#allocation3], 1 }
 0x3ae   :  { %924 = vsyncpa [#allocation3 + $0x1], 1 }

</bundles_post_ra>
